<compile_context>
chip_gen: v7x
topology: tpu7x:2x2x1
jax: 0.10.0
libtpu: 0.0.40
codegen_flags: <defaults>
</compile_context>

<pallas_src>
import functools

import jax
import jax.numpy as jnp
import numpy as np
from jax.experimental import pallas as pl
from jax.experimental.pallas import tpu as pltpu


# ----------------------------- kernels --------------------------------------


def _pointwise_kernel(g16_ref, g8_ref, g4_ref, w16_ref, w8_ref, w4_ref, b_ref,
                      out_ref):
    # g16/g8/g4 arrive already area-pooled (f32 pooling done in the wrapper) as
    # (tp, C*) bf16 tiles; this kernel is three MXU matmuls with f32 accumulation
    # plus the pre-summed bias.
    f32 = jnp.float32
    acc = jnp.dot(g16_ref[...], w16_ref[...], preferred_element_type=f32)
    acc = acc + jnp.dot(g8_ref[...], w8_ref[...], preferred_element_type=f32)
    acc = acc + jnp.dot(g4_ref[...], w4_ref[...], preferred_element_type=f32)
    acc = acc + b_ref[...]                       # (1, mid) broadcasts over pixels
    out_ref[...] = acc.astype(out_ref.dtype)


def _transform_kernel(xg_ref, xh_ref, wt_ref, bt_ref, out_ref, *, H, W, P, mid, hid):
    # xg_ref: (P, mid) f32   unpadded flattened g_mid image
    # xh_ref: (P, hid) f32   unpadded flattened hidden state
    # wt_ref: (9, mid + hid, 3*hid) bf16    bt_ref: (1, 3*hid) f32
    # out_ref: (P, hid) f32
    f32 = jnp.float32
    cdt = wt_ref.dtype

    xg32 = xg_ref[...]                                  # (P, mid) f32
    xh32 = xh_ref[...]                                  # (P, hid) f32

    # Edge masks built in-kernel from a 2-D iota (review #7).
    idx = jax.lax.broadcasted_iota(jnp.int32, (P, 1), 0)
    row = idx // W
    col = idx - row * W
    m_top = (row != 0).astype(f32)          # dy == 0 reads the row above
    m_bot = (row != H - 1).astype(f32)      # dy == 2 reads the row below
    m_lft = (col != 0).astype(f32)          # dx == 0 reads the pixel to the left
    m_rgt = (col != W - 1).astype(f32)      # dx == 2 reads the pixel to the right

    # Single fused accumulator over all 3 gates, bias preloaded.
    acc = jnp.broadcast_to(bt_ref[...], (P, 3 * hid)).astype(f32)

    for dy in range(3):
        # Row offset: roll the f32 images (arbitrary sublane rotate amounts are
        # safe for 32-bit data), then cast to bf16 ONCE per row offset.
        if dy == 0:
            g32 = pltpu.roll(xg32, shift=W, axis=0)       # tap reads pixel p - W
            h32 = pltpu.roll(xh32, shift=W, axis=0)
            mv = m_top
        elif dy == 2:
            g32 = pltpu.roll(xg32, shift=P - W, axis=0)   # tap reads pixel p + W
            h32 = pltpu.roll(xh32, shift=P - W, axis=0)
            mv = m_bot
        else:
            g32, h32 = xg32, xh32
            mv = None
        g_dy = g32.astype(cdt)
        h_dy = h32.astype(cdt)

        for dx in range(3):
            # Column offset: +-1 sublane rolls of the already-bf16 row variants
            # (XLU slot); wrap rows are always covered by the masks below.
            if dx == 0:
                gt = pltpu.roll(g_dy, shift=1, axis=0)        # reads pixel p - 1
                ht = pltpu.roll(h_dy, shift=1, axis=0)
                mh = m_lft
            elif dx == 2:
                gt = pltpu.roll(g_dy, shift=P - 1, axis=0)    # reads pixel p + 1
                ht = pltpu.roll(h_dy, shift=P - 1, axis=0)
                mh = m_rgt
            else:
                gt, ht = g_dy, h_dy
                mh = None

            k = dy * 3 + dx
            contrib = jnp.dot(gt, wt_ref[k, :mid, :], preferred_element_type=f32)
            contrib = contrib + jnp.dot(ht, wt_ref[k, mid:, :],
                                        preferred_element_type=f32)
            if mv is not None and mh is not None:
                contrib = contrib * (mv * mh)
            elif mv is not None:
                contrib = contrib * mv
            elif mh is not None:
                contrib = contrib * mh
            acc = acc + contrib

    forget_gate = jax.nn.sigmoid(acc[:, :hid])
    update_gate = jax.nn.sigmoid(acc[:, hid:2 * hid])
    new_value = jnp.tanh(acc[:, 2 * hid:])

    # Gating uses the full-precision f32 hidden state.
    new_h = forget_gate * xh32 * (1.0 - update_gate) + update_gate * new_value
    out_ref[...] = new_h.astype(out_ref.dtype)


# ----------------------------- wrapper ---------------------------------------


def _to_flat_hwc(x):
    # (B, N, C, H, W) -> (B*N, H*W, C)
    B, N, C, H, W = x.shape
    return x.reshape(B * N, C, H, W).transpose(0, 2, 3, 1).reshape(B * N, H * W, C)


def _pool_mean_flat(x, r):
    # (B, N, C, r*H, r*W) -> f32 area mean -> (B*N, H*W, C)
    B, N, C, Hr, Wr = x.shape
    H, W = Hr // r, Wr // r
    x = x.reshape(B * N, C, H, r, W, r).mean(axis=(3, 5))     # f32 pooling
    return x.transpose(0, 2, 3, 1).reshape(B * N, H * W, C)


def _pick_tile(P, bytes_per_row, budget=8 << 20):
    # Prefer a single whole-image tile when it fits the VMEM budget (review #5);
    # otherwise take the largest divisor tile that fits.
    if P * bytes_per_row <= budget:
        return P
    for cand in (4096, 2048, 1024, 512, 256, 128, 64, 32, 16, 8):
        if cand < P and P % cand == 0 and cand * bytes_per_row <= budget:
            return cand
    # TODO(synk): pad P up to a tile multiple for very large, non-divisible P.
    return P


def _vmem_limit_bytes(block_bytes):
    # Actual block working set, double-buffered, plus headroom for compiler
    # scratch (review #6).  Never exceeds the smallest physical VMEM (v7x 64 MiB).
    need = 2 * block_bytes + (8 << 20)
    return int(min(max(need, 32 << 20), 64 << 20))


def hidden_updater_forward(g, h, params):
    g16, g8, g4 = g
    B, N, _, H, W = g16.shape
    BN, P = B * N, H * W
    hid = params["bt"].shape[-1] // 3
    mid = params["w16"].shape[-1]
    cin = mid + hid
    cdt = jnp.bfloat16        # MXU operand dtype (f32 accumulation inside)

    # ---- glue: f32 area pooling + channels-last flatten, then bf16 cast ----
    g16f = _to_flat_hwc(g16).astype(cdt)          # (BN, P, C16)
    g8p = _pool_mean_flat(g8, 2).astype(cdt)      # (BN, P, C8)
    g4p = _pool_mean_flat(g4, 4).astype(cdt)      # (BN, P, C4)
    C16, C8, C4 = g16f.shape[-1], g8p.shape[-1], g4p.shape[-1]
    b_sum = (params["b16"] + params["b8"] + params["b4"]).reshape(1, mid)
    b_sum = b_sum.astype(jnp.float32)
    w16 = params["w16"].astype(cdt)
    w8 = params["w8"].astype(cdt)
    w4 = params["w4"].astype(cdt)

    row_bytes1 = 2 * (C16 + C8 + C4) + 4 * mid
    tp = _pick_tile(P, row_bytes1)
    npt = P // tp
    blk1 = (tp * (C16 + C8 + C4) * 2 + tp * mid * 4
            + (C16 + C8 + C4) * mid * 2 + mid * 4)
    vmem1 = _vmem_limit_bytes(blk1)

    # ---- kernel 1: fused 1x1 convs on pre-pooled inputs (grid: group x pixel-tile) ----
    g_mid = pl.pallas_call(
        _pointwise_kernel,
        out_shape=jax.ShapeDtypeStruct((BN, P, mid), jnp.float32),
        grid=(BN, npt),
        in_specs=[
            pl.BlockSpec((None, tp, C16), lambda b, t: (b, t, 0)),
            pl.BlockSpec((None, tp, C8), lambda b, t: (b, t, 0)),
            pl.BlockSpec((None, tp, C4), lambda b, t: (b, t, 0)),
            pl.BlockSpec((C16, mid), lambda b, t: (0, 0)),
            pl.BlockSpec((C8, mid), lambda b, t: (0, 0)),
            pl.BlockSpec((C4, mid), lambda b, t: (0, 0)),
            pl.BlockSpec((1, mid), lambda b, t: (0, 0)),
        ],
        out_specs=pl.BlockSpec((None, tp, mid), lambda b, t: (b, t, 0)),
        compiler_params=pltpu.CompilerParams(
            dimension_semantics=("parallel", "parallel"),
            vmem_limit_bytes=vmem1),
    )(g16f, g8p, g4p, w16, w8, w4, b_sum)

    # ---- kernel 2: 3x3 conv via rolls+masks (no pad pass, no im2col) + gating ----
    h_flat = _to_flat_hwc(h).astype(jnp.float32)                      # (BN, P, hid)
    wt = params["wt"].astype(cdt)                                     # (9, cin, 3*hid)
    bt = params["bt"].reshape(1, 3 * hid).astype(jnp.float32)

    blk2 = (P * mid * 4 + P * hid * 4 + 9 * cin * 3 * hid * 2
            + 3 * hid * 4 + P * hid * 4)
    vmem2 = _vmem_limit_bytes(blk2)

    kernel2 = functools.partial(_transform_kernel, H=H, W=W, P=P, mid=mid, hid=hid)

    new_h_flat = pl.pallas_call(
        kernel2,
        out_shape=jax.ShapeDtypeStruct((BN, P, hid), jnp.float32),
        grid=(BN,),
        in_specs=[
            pl.BlockSpec((None, P, mid), lambda b: (b, 0, 0)),
            pl.BlockSpec((None, P, hid), lambda b: (b, 0, 0)),
            pl.BlockSpec((9, cin, 3 * hid), lambda b: (0, 0, 0)),
            pl.BlockSpec((1, 3 * hid), lambda b: (0, 0)),
        ],
        out_specs=pl.BlockSpec((None, P, hid), lambda b: (b, 0, 0)),
        compiler_params=pltpu.CompilerParams(
            dimension_semantics=("parallel",),
            vmem_limit_bytes=vmem2),
    )(g_mid, h_flat, wt, bt)

    # back to the PyTorch layout (B, N, hidden, H, W)
    return new_h_flat.reshape(B, N, H, W, hid).transpose(0, 1, 4, 2, 3)


# --------------------------- params & reference ------------------------------


def init_params(key, g_dims, mid_dim, hidden_dim):
    ks = jax.random.split(key, 8)

    def xavier(k, fan_in, fan_out, shape):
        std = float(np.sqrt(2.0 / (fan_in + fan_out)))
        return std * jax.random.normal(k, shape, dtype=jnp.float32)

    cin = mid_dim + hidden_dim
    return {
        # 1x1 convs stored directly as (Cin, mid_dim) matmul weights
        "w16": xavier(ks[0], g_dims[0], mid_dim, (g_dims[0], mid_dim)),
        "w8": xavier(ks[1], g_dims[1], mid_dim, (g_dims[1], mid_dim)),
        "w4": xavier(ks[2], g_dims[2], mid_dim, (g_dims[2], mid_dim)),
        "b16": 0.05 * jax.random.normal(ks[3], (mid_dim,), dtype=jnp.float32),
        "b8": 0.05 * jax.random.normal(ks[4], (mid_dim,), dtype=jnp.float32),
        "b4": 0.05 * jax.random.normal(ks[5], (mid_dim,), dtype=jnp.float32),
        # 3x3 transform conv stored as (tap=ky*3+kx, Cin, 3*hidden); xavier_normal
        "wt": xavier(ks[6], 9 * cin, 9 * hidden_dim * 3, (9, cin, hidden_dim * 3)),
        "bt": 0.05 * jax.random.normal(ks[7], (hidden_dim * 3,), dtype=jnp.float32),
    }


def reference_forward(g, h, params):
    """Pure-JAX f32 reference matching the PyTorch forward semantics."""
    g16, g8, g4 = g
    hidden_dim = params["bt"].shape[-1] // 3

    def pool(x, r):
        B, N, C, Hr, Wr = x.shape
        return x.reshape(B, N, C, Hr // r, r, Wr // r, r).mean(axis=(4, 6))

    def pw(x, w, b):
        return jnp.einsum("bnchw,cm->bnmhw", x, w) + b[None, None, :, None, None]

    gm = (pw(g16, params["w16"], params["b16"])
          + pw(pool(g8, 2), params["w8"], params["b8"])
          + pw(pool(g4, 4), params["w4"], params["b4"]))
    x = jnp.concatenate([gm, h], axis=2)
    B, N, _, H, W = x.shape
    xp = jnp.pad(x, ((0, 0), (0, 0), (0, 0), (1, 1), (1, 1)))
    vals = jnp.broadcast_to(params["bt"][None, None, :, None, None],
                            (B, N, 3 * hidden_dim, H, W)).astype(jnp.float32)
    for ky in range(3):
        for kx in range(3):
            vals = vals + jnp.einsum("bnchw,cm->bnmhw",
                                     xp[:, :, :, ky:ky + H, kx:kx + W],
                                     params["wt"][ky * 3 + kx])
    f = jax.nn.sigmoid(vals[:, :, :hidden_dim])
    u = jax.nn.sigmoid(vals[:, :, hidden_dim:2 * hidden_dim])
    nv = jnp.tanh(vals[:, :, 2 * hidden_dim:])
    return f * h * (1.0 - u) + u * nv


# --------------------------------- main ---------------------------------------


if __name__ == "__main__":
    B, N = 2, 2                # batch, num_objects
    H = W = 8                  # stride-16 feature resolution
    g_dims = (8, 12, 16)       # channels of g[0] (1/16), g[1] (1/8), g[2] (1/4)
    mid_dim, hidden_dim = 16, 8

    key = jax.random.PRNGKey(0)
    kg16, kg8, kg4, kh, kp = jax.random.split(key, 5)
    g16 = jax.random.normal(kg16, (B, N, g_dims[0], H, W), dtype=jnp.float32)
    g8 = jax.random.normal(kg8, (B, N, g_dims[1], 2 * H, 2 * W), dtype=jnp.float32)
    g4 = jax.random.normal(kg4, (B, N, g_dims[2], 4 * H, 4 * W), dtype=jnp.float32)
    h = jax.random.normal(kh, (B, N, hidden_dim, H, W), dtype=jnp.float32)
    params = init_params(kp, g_dims, mid_dim, hidden_dim)

    new_h = jax.block_until_ready(hidden_updater_forward((g16, g8, g4), h, params))
    assert new_h.shape == (B, N, hidden_dim, H, W)

    ref = jax.block_until_ready(reference_forward((g16, g8, g4), h, params))
    # bf16 MXU operands (f32 accumulation) vs f32 reference -> slightly looser tol
    np.testing.assert_allclose(np.asarray(new_h), np.asarray(ref),
                               rtol=3e-2, atol=3e-2)
    print("KERNEL_OK")
</pallas_src>

<mosaic_0001>
module attributes {stable_mosaic.version = 11 : i64} {
  func.func @_pointwise_kernel(%arg0: i32, %arg1: i32, %arg2: memref<1x64x8xbf16, #tpu.memory_space<vmem>>, %arg3: memref<1x64x12xbf16, #tpu.memory_space<vmem>>, %arg4: memref<1x64x16xbf16, #tpu.memory_space<vmem>>, %arg5: memref<8x16xbf16, #tpu.memory_space<vmem>>, %arg6: memref<12x16xbf16, #tpu.memory_space<vmem>>, %arg7: memref<16x16xbf16, #tpu.memory_space<vmem>>, %arg8: memref<1x16xf32, #tpu.memory_space<vmem>>, %arg9: memref<1x64x16xf32, #tpu.memory_space<vmem>>) attributes {dimension_semantics = [#tpu.dimension_semantics<parallel>, #tpu.dimension_semantics<parallel>], iteration_bounds = array<i64: 4, 1>, scalar_prefetch = 0 : i64, scratch_operands = 0 : i64, tpu.core_type = #tpu.core_type<tc>, window_params = [{transform_indices = @transform_0, window_bounds = array<i64: 1, 64, 8>}, {transform_indices = @transform_1, window_bounds = array<i64: 1, 64, 12>}, {transform_indices = @transform_2, window_bounds = array<i64: 1, 64, 16>}, {pipeline_mode = #tpu.pipeline_mode<synchronous>, transform_indices = @transform_3, window_bounds = array<i64: 8, 16>}, {pipeline_mode = #tpu.pipeline_mode<synchronous>, transform_indices = @transform_4, window_bounds = array<i64: 12, 16>}, {pipeline_mode = #tpu.pipeline_mode<synchronous>, transform_indices = @transform_5, window_bounds = array<i64: 16, 16>}, {pipeline_mode = #tpu.pipeline_mode<synchronous>, transform_indices = @transform_6, window_bounds = array<i64: 1, 16>}, {transform_indices = @transform_7, window_bounds = array<i64: 1, 64, 16>}]} {
    %c0 = arith.constant 0 : index
    %c0_0 = arith.constant 0 : index
    %c0_1 = arith.constant 0 : index
    %0 = vector.load %arg2[%c0, %c0_0, %c0_1] : memref<1x64x8xbf16, #tpu.memory_space<vmem>>, vector<1x64x8xbf16>
    %1 = vector.shape_cast %0 : vector<1x64x8xbf16> to vector<64x8xbf16>
    %c0_2 = arith.constant 0 : index
    %c0_3 = arith.constant 0 : index
    %2 = vector.load %arg5[%c0_2, %c0_3] : memref<8x16xbf16, #tpu.memory_space<vmem>>, vector<8x16xbf16>
    %cst = arith.constant dense<0.000000e+00> : vector<64x16xf32>
    %3 = tpu.matmul %1, %2, %cst {dimension_numbers = #tpu.dot_dimension_numbers<[1], [0], [0], [1], [0, 0, 1, 1], [], []>} : vector<64x8xbf16>, vector<8x16xbf16>, vector<64x16xf32> -> vector<64x16xf32>
    %c0_4 = arith.constant 0 : index
    %c0_5 = arith.constant 0 : index
    %c0_6 = arith.constant 0 : index
    %4 = vector.load %arg3[%c0_4, %c0_5, %c0_6] : memref<1x64x12xbf16, #tpu.memory_space<vmem>>, vector<1x64x12xbf16>
    %5 = vector.shape_cast %4 : vector<1x64x12xbf16> to vector<64x12xbf16>
    %c0_7 = arith.constant 0 : index
    %c0_8 = arith.constant 0 : index
    %6 = vector.load %arg6[%c0_7, %c0_8] : memref<12x16xbf16, #tpu.memory_space<vmem>>, vector<12x16xbf16>
    %cst_9 = arith.constant dense<0.000000e+00> : vector<64x16xf32>
    %7 = tpu.matmul %5, %6, %cst_9 {dimension_numbers = #tpu.dot_dimension_numbers<[1], [0], [0], [1], [0, 0, 1, 1], [], []>} : vector<64x12xbf16>, vector<12x16xbf16>, vector<64x16xf32> -> vector<64x16xf32>
    %8 = arith.addf %3, %7 : vector<64x16xf32>
    %c0_10 = arith.constant 0 : index
    %c0_11 = arith.constant 0 : index
    %c0_12 = arith.constant 0 : index
    %9 = vector.load %arg4[%c0_10, %c0_11, %c0_12] : memref<1x64x16xbf16, #tpu.memory_space<vmem>>, vector<1x64x16xbf16>
    %10 = vector.shape_cast %9 : vector<1x64x16xbf16> to vector<64x16xbf16>
    %c0_13 = arith.constant 0 : index
    %c0_14 = arith.constant 0 : index
    %11 = vector.load %arg7[%c0_13, %c0_14] : memref<16x16xbf16, #tpu.memory_space<vmem>>, vector<16x16xbf16>
    %cst_15 = arith.constant dense<0.000000e+00> : vector<64x16xf32>
    %12 = tpu.matmul %10, %11, %cst_15 {dimension_numbers = #tpu.dot_dimension_numbers<[1], [0], [0], [1], [0, 0, 1, 1], [], []>} : vector<64x16xbf16>, vector<16x16xbf16>, vector<64x16xf32> -> vector<64x16xf32>
    %13 = arith.addf %8, %12 : vector<64x16xf32>
    %c0_16 = arith.constant 0 : index
    %c0_17 = arith.constant 0 : index
    %14 = vector.load %arg8[%c0_16, %c0_17] : memref<1x16xf32, #tpu.memory_space<vmem>>, vector<1x16xf32>
    %15 = vector.broadcast %14 : vector<1x16xf32> to vector<64x16xf32>
    %16 = arith.addf %13, %15 : vector<64x16xf32>
    %c0_18 = arith.constant 0 : index
    %c0_19 = arith.constant 0 : index
    %c0_20 = arith.constant 0 : index
    %17 = vector.load %arg9[%c0_18, %c0_19, %c0_20] : memref<1x64x16xf32, #tpu.memory_space<vmem>>, vector<1x64x16xf32>
    %18 = vector.shape_cast %17 : vector<1x64x16xf32> to vector<64x16xf32>
    %19 = vector.shape_cast %16 : vector<64x16xf32> to vector<1x64x16xf32>
    tpu.vector_store %arg9[%c0_18, %c0_19, %c0_20], %19 {strides = array<i32>} : memref<1x64x16xf32, #tpu.memory_space<vmem>>, vector<1x64x16xf32>,
    return
  }
  func.func @transform_0(%arg0: i32, %arg1: i32) -> (i32, i32, i32) {
    %c0_i32 = arith.constant 0 : i32
    %c0_i32_0 = arith.constant 0 : i32
    return %arg0, %arg1, %c0_i32 : i32, i32, i32
  }
  func.func @transform_1(%arg0: i32, %arg1: i32) -> (i32, i32, i32) {
    %c0_i32 = arith.constant 0 : i32
    %c0_i32_0 = arith.constant 0 : i32
    return %arg0, %arg1, %c0_i32 : i32, i32, i32
  }
  func.func @transform_2(%arg0: i32, %arg1: i32) -> (i32, i32, i32) {
    %c0_i32 = arith.constant 0 : i32
    %c0_i32_0 = arith.constant 0 : i32
    return %arg0, %arg1, %c0_i32 : i32, i32, i32
  }
  func.func @transform_3(%arg0: i32, %arg1: i32) -> (i32, i32) {
    %c0_i32 = arith.constant 0 : i32
    %c0_i32_0 = arith.constant 0 : i32
    %c0_i32_1 = arith.constant 0 : i32
    return %c0_i32, %c0_i32_0 : i32, i32
  }
  func.func @transform_4(%arg0: i32, %arg1: i32) -> (i32, i32) {
    %c0_i32 = arith.constant 0 : i32
    %c0_i32_0 = arith.constant 0 : i32
    %c0_i32_1 = arith.constant 0 : i32
    return %c0_i32, %c0_i32_0 : i32, i32
  }
  func.func @transform_5(%arg0: i32, %arg1: i32) -> (i32, i32) {
    %c0_i32 = arith.constant 0 : i32
    %c0_i32_0 = arith.constant 0 : i32
    %c0_i32_1 = arith.constant 0 : i32
    return %c0_i32, %c0_i32_0 : i32, i32
  }
  func.func @transform_6(%arg0: i32, %arg1: i32) -> (i32, i32) {
    %c0_i32 = arith.constant 0 : i32
    %c0_i32_0 = arith.constant 0 : i32
    %c0_i32_1 = arith.constant 0 : i32
    return %c0_i32, %c0_i32_0 : i32, i32
  }
  func.func @transform_7(%arg0: i32, %arg1: i32) -> (i32, i32, i32) {
    %c0_i32 = arith.constant 0 : i32
    %c0_i32_0 = arith.constant 0 : i32
    return %arg0, %arg1, %c0_i32 : i32, i32, i32
  }
}

</mosaic_0001>

<bundles_post_ra>
// kernel: tpu_custom_call.1
= control target key start
LH: loop header
LB: loop body
LE: loop exit
PB: predicated region body
PF: predicated region fallthrough
CT: control target
= control target key end

     0   :  { %s1101_s24 = smov 0   ;;  %s1103_s25 = smov 0   ;;  %s1186_s0 = inlined_call_operand.vmem [shape: bf16[4,64,8], index: 0, kind: input, shape index: {}]   ;;  %s1187_s1 = inlined_call_operand.vmem [shape: bf16[4,64,12], index: 1, kind: input, shape index: {}]   ;;  %s1188_s2 = inlined_call_operand.vmem [shape: bf16[4,64,16], index: 2, kind: input, shape index: {}]   ;;  %s1189_s3 = inlined_call_operand.vmem [shape: bf16[8,16], index: 3, kind: input, shape index: {}]   ;;  %s1190_s4 = inlined_call_operand.vmem [shape: bf16[12,16], index: 4, kind: input, shape index: {}]   ;;  %s1191_s5 = inlined_call_operand.vmem [shape: bf16[16,16], index: 5, kind: input, shape index: {}]   ;;  %s1192_s6 = inlined_call_operand.vmem [shape: f32[1,16], index: 6, kind: input, shape index: {}]   ;;  %s1193_s7 = inlined_call_operand.vmem [shape: f32[4,64,16], index: 7, kind: output, shape index: {}]  }
   0x1   :  { %s1105_s26 = smov 0  }
   0x2 LB: > { %s29_s27 = sadd.s32 1, %s1055_s25  ;;  %p891_p0 = scmp.ge.s32.totalorder %s1059_s26, 1  ;;  %s1059_s26 = sphi %s1105_s26, %s17_s26   ;;  %s1055_s25 = sphi %s1103_s25, %s1195_s25   ;;  %s1051_s24 = sphi %s1101_s24, %s1194_s24  }
   0x3   : > { %p31_p1 = scmp.ge.s32.totalorder %s29_s27, 4  ;;  %p292_p2 = scmp.lt.s32.totalorder %s1059_s26, 5 }
   0x5   : > { %s1197_s27 = smov (%p31_p1, %s29_s27), 0  ;;  %p293_p3 = pnand %p891_p0, %p292_p2 }
   0x6   : > { %v1023_v0 = vld [vmem:[%s1190_s4] sm:$0x3f] (!%p293_p3)   ;;  %vm448_vm0 = vcmask (!%p293_p3), 1045504   ;;  %vm550_vm1 = vcmask (!%p293_p3), 1043456   ;;  %p351_p4 = scmp.lt.s32.totalorder (!%p293_p3), %s1051_s24, 3  ;;  %vm435_vm2 = vcmask (!%p293_p3), 97280  }
   0x7   : > { %296 = sbr.rel (%p293_p3) target bundleno = 260 (0x104), region = 48  ;;  %v399_v1 = vld [vmem:[%s1189_s3] sm:$0xf] (!%p293_p3)  ;;  %996 = vmatprep.subr.msk.bf16.mxu1 (!%p293_p3), %vm448_vm0, %v1023_v0  ;;  %v450_v2 = vsel (!%p293_p3), %vm448_vm0, %v1023_v0, 0  ;;  %vm537_vm3 = vcmask (!%p293_p3), 64512   ;;  %vm655_vm4 = vcmask (!%p293_p3), 130048  }
   0x8   : > { %997 = vmatprep.subr.msk.bf16.mxu0 (!%p293_p3), %vm550_vm1, %v399_v1  ;;  %v552_v3 = vsel (!%p293_p3), %vm550_vm1, %v399_v1, 0  ;;  %v1026_v4 = vld [vmem:[%s1191_s5] sm:$0xff] (!%p293_p3)   ;;  %949 = vmatpush3.bf16.msra.mxu1 (!%p293_p3), %v450_v2 }
   0x9   : > { %959 = vmatpush3.bf16.msra.mxu0 (!%p293_p3), %v552_v3  ;;  %998 = vmatprep.subr.msk.bf16.mxu1 (!%p293_p3), %vm550_vm1, %v399_v1  ;;  %v926_v22 = vld [vmem:[%s1192_s6] ss:$0 sm:$0xff] (!%p293_p3) }
   0xa   : > { %968 = vmatprep.subr.bf16.mxu0 (!%p293_p3), %v1026_v4 }
   0xe   : > { %s1199_s24 = smov (!%p351_p4, %s1051_s24), 3 }
   0xf   : > { %s929_s11 = sshll.u32 %s1199_s24, 5  ;;  %s932_s21 = sshll.u32 %s1199_s24, 6 }
  0x10   : > { %s368_s14 = scalar_lea.vmem %s1187_s1, %s929_s11  ;;  %s358_s17 = scalar_lea.vmem %s1186_s0, %s929_s11 }
  0x11   : > { %v1024_v5 = vld [vmem:[%s368_s14] sm:$0xff]   ;;  %v1027_v7 = vld [vmem:[%s368_s14 + $0x8] sm:$0xff]   ;;  %s378_s20 = scalar_lea.vmem %s1188_s2, %s929_s11  ;;  %v1029_v9 = vld [vmem:[%s368_s14 + $0x10] sm:$0xff]   ;;  %s1159_s30 = scalar_lea.vmem %s1193_s7, %s932_s21 }
  0x12   : > { %v1025_v6 = vld [vmem:[%s358_s17] sm:$0xff]   ;;  %950 = vmatprep.mubr.msk.bf16.mxu1 %vm435_vm2, %v1024_v5  ;;  %v1028_v8 = vld [vmem:[%s358_s17 + $0x8] sm:$0xff]   ;;  %v1030_v11 = vld [vmem:[%s368_s14 + $0x18] sm:$0xff]  }
  0x13   : > { %960 = vmatprep.mubr.msk.bf16.mxu0 %vm537_vm3, %v1025_v6  ;;  %951 = vmatmul.mubr.msk.bf16.vlgmr.msra.gmra.mrb[0].mxu1 %vm435_vm2, %v1027_v7  ;;  %v1031_v10 = vld [vmem:[%s378_s20] sm:$0xff]   ;;  %v1033_v12 = vld [vmem:[%s358_s17 + $0x10] sm:$0xff]   ;;  %v1032_v13 = vld [vmem:[%s378_s20 + $0x8] sm:$0xff]  }
  0x14   : > { %979 = vmatpush3.bf16.msra.mxu1 %v552_v3  ;;  %961 = vmatmul.mubr.msk.bf16.vlgmr.msra.gmra.mrb[0].mxu0 %vm537_vm3, %v1028_v8  ;;  %v1034_v14 = vld [vmem:[%s378_s20 + $0x10] sm:$0xff]   ;;  %v1035_v15 = vld [vmem:[%s358_s17 + $0x18] sm:$0xff]  }
  0x15   : > { %969 = vmatpush3.bf16.msra.mxu0 %v1026_v4  ;;  %954 = vmatprep.mubr.msk.bf16.mxu1 %vm435_vm2, %v1029_v9  ;;  %v1036_v16 = vld [vmem:[%s378_s20 + $0x18] sm:$0xff]  }
  0x16   : > { %970 = vmatprep.mubr.msk.bf16.mxu0 %vm655_vm4, %v1031_v10 }
  0x1b   : > { %955 = vmatmul.mubr.msk.bf16.gmra.mrb[4].mxu1 %vm435_vm2, %v1030_v11 }
  0x1c   : > { %964 = vmatprep.mubr.msk.bf16.mxu1 %vm537_vm3, %v1033_v12 }
  0x20   : > { %971 = vmatmul.mubr.msk.bf16.vlgmr.msra.gmra.mrb[0].mxu0 %vm655_vm4, %v1032_v13 }
  0x21   : > { %974 = vmatprep.mubr.msk.bf16.mxu0 %vm655_vm4, %v1034_v14 }
  0x27   : > { %965 = vmatmul.mubr.msk.bf16.vlgmr.msra.gmra.mrb[4].mxu1 %vm537_vm3, %v1035_v15 }
  0x28   : > { %975 = vmatmul.mubr.msk.bf16.gmra.mrb[4].mxu0 %vm655_vm4, %v1036_v16 }
  0xe6   : > { %v952_v17 = vpop.f32.mrb[0].mxu1 }
  0xe7   : > { %v486_v18 = vpop.f32.mrb[1].mxu1 }
  0xe8   : > { %v953_v19 = vpop.f32.mrb[2].mxu1 }
  0xe9   : > { %v489_v20 = vpop.f32.mrb[3].mxu1 }
  0xf3   : > { %v972_v21 = vpop.f32.mrb[0].mxu0 }
  0xf4   : > { %v980_v23 = vadd.f32 %v972_v21, %v952_v17  ;;  %v702_v24 = vpop.f32.mrb[1].mxu0 }
  0xf5   : > { %v981_v25 = vadd.f32 %v702_v24, %v486_v18  ;;  %v973_v26 = vpop.f32.mrb[2].mxu0 }
  0xf6   : > { %v750_v27 = vadd.f32 %v980_v23, %v926_v22  ;;  %v982_v28 = vadd.f32 %v973_v26, %v953_v19  ;;  %v705_v29 = vpop.f32.mrb[3].mxu0 }
  0xf7   : > { %v748_v30 = vadd.f32 %v981_v25, %v926_v22  ;;  %v983_v31 = vadd.f32 %v705_v29, %v489_v20 }
  0xf8   : > { %758 = vst.msk [vmem:[%s1159_s30 + $0x10] sm:$0xff] %vm655_vm4, %v750_v27  ;;  %v751_v32 = vadd.f32 %v982_v28, %v926_v22 }
  0xf9   : > { %756 = vst.msk [vmem:[%s1159_s30] sm:$0xff] %vm655_vm4, %v748_v30  ;;  %v749_v33 = vadd.f32 %v983_v31, %v926_v22 }
  0xfa   : > { %759 = vst.msk [vmem:[%s1159_s30 + $0x18] sm:$0xff] %vm655_vm4, %v751_v32  ;;  %v966_v34 = vpop.f32.mrb[4].mxu1 }
  0xfb   : > { %757 = vst.msk [vmem:[%s1159_s30 + $0x8] sm:$0xff] %vm655_vm4, %v749_v33  ;;  %v976_v35 = vpop.f32.mrb[4].mxu0  ;;  %v604_v36 = vpop.f32.mrb[5].mxu1 }
  0xfc   : > { %v984_v37 = vadd.f32 %v976_v35, %v966_v34  ;;  %v718_v38 = vpop.f32.mrb[5].mxu0  ;;  %v967_v39 = vpop.f32.mrb[6].mxu1 }
  0xfd   : > { %v985_v40 = vadd.f32 %v718_v38, %v604_v36  ;;  %v977_v41 = vpop.f32.mrb[6].mxu0  ;;  %v607_v42 = vpop.f32.mrb[7].mxu1 }
  0xfe   : > { %v754_v43 = vadd.f32 %v984_v37, %v926_v22  ;;  %v986_v44 = vadd.f32 %v977_v41, %v967_v39  ;;  %v721_v45 = vpop.f32.mrb[7].mxu0 }
  0xff   : > { %v752_v46 = vadd.f32 %v985_v40, %v926_v22  ;;  %v987_v47 = vadd.f32 %v721_v45, %v607_v42 }
 0x100   : > { %762 = vst.msk [vmem:[%s1159_s30 + $0x30] sm:$0xff] %vm655_vm4, %v754_v43  ;;  %v755_v48 = vadd.f32 %v986_v44, %v926_v22 }
 0x101   : > { %760 = vst.msk [vmem:[%s1159_s30 + $0x20] sm:$0xff] %vm655_vm4, %v752_v46  ;;  %v753_v49 = vadd.f32 %v987_v47, %v926_v22 }
 0x102   : > { %763 = vst.msk [vmem:[%s1159_s30 + $0x38] sm:$0xff] %vm655_vm4, %v755_v48 }
 0x103   : > { %761 = vst.msk [vmem:[%s1159_s30 + $0x28] sm:$0xff] %vm655_vm4, %v753_v49 }
 0x104 PF: > { %s17_s26 = sadd.s32 1, %s1059_s26   ;;  %s1194_s24 = smov %s1055_s25 }
 0x105   : > { %p14_p5 = scmp.ge.s32.totalorder %s17_s26, 6   ;;  %s1195_s25 = smov %s1197_s27 }
 0x107   :  { %16 = sbr.rel (!%p14_p5) target bundleno = 2 (0x2), region = 84 }

</bundles_post_ra>
